<compile_context>
chip_gen: v7x
topology: tpu7x:2x2x1
jax: 0.10.0
libtpu: 0.0.40
codegen_flags: <defaults>
</compile_context>

<pallas_src>
import functools

import jax
import jax.numpy as jnp
from jax.experimental import pallas as pl
from jax.experimental.pallas import tpu as pltpu


def _spatial_gate_kernel(x_ref, m_ref, o_ref, *, C, HW, flat):
    """One block: x slab + fused (2*HW, HW) conv operator -> gated output."""
    x = x_ref[...]                                   # single load, native dtype
    if flat:
        # x: (Bt, C*HW); per-channel views are static, 128-aligned lane slices.
        chans = [x[:, c * HW:(c + 1) * HW] for c in range(C)]
        ch_max = functools.reduce(jnp.maximum, chans).astype(jnp.float32)
        ch_sum = functools.reduce(
            jnp.add, [c.astype(jnp.float32) for c in chans])
    else:
        # x: (Bt, C, HW); reduce over the channel (second-minor) axis.
        ch_max = jnp.max(x, axis=1).astype(jnp.float32)
        ch_sum = jnp.sum(x.astype(jnp.float32), axis=1)
    pooled = jnp.concatenate(
        [ch_max, ch_sum * jnp.float32(1.0 / C)], axis=-1)        # (Bt, 2*HW)

    # 5x5 SAME conv over [max, mean] as a single bf16 MXU matmul (f32 accum).
    acc = jnp.dot(pooled.astype(jnp.bfloat16), m_ref[...],
                  preferred_element_type=jnp.float32)            # (Bt, HW)

    # Sigmoid gate (EUP), broadcast over channels; multiply/store in input dtype.
    scale = jax.nn.sigmoid(acc).astype(x.dtype)
    if flat:
        o_ref[...] = (x * jnp.concatenate([scale] * C, axis=-1)).astype(o_ref.dtype)
    else:
        o_ref[...] = (x * scale[:, None, :]).astype(o_ref.dtype)


def _conv_as_matmul_operator(conv_weight, H, W):
    """Build M of shape (2*H*W, H*W) such that, with row-major (h, w) flattening,
        conv2d_SAME(pooled, weight) == concat([pooled_max, pooled_mean], -1) @ M
    (cross-correlation, no bias, zero padding folded into the operator).
    Weight-only preprocessing — no data compute is hoisted out of the kernel."""
    K = conv_weight.shape[-1]
    P = (K - 1) // 2
    w = conv_weight.reshape(2, K, K).astype(jnp.float32)          # (Cin=2, K, K)

    # W-direction banded Toeplitz: tw[c, kh, i, j] = w[c, kh, i - j + P] (else 0)
    ii = jnp.arange(W)[:, None]
    jj = jnp.arange(W)[None, :]
    kw = ii - jj + P                                              # (W, W)
    valid = (kw >= 0) & (kw < K)
    tw = jnp.where(valid[None, None],
                   w[:, :, jnp.clip(kw, 0, K - 1)], 0.0)          # (2, K, W, W)

    # H-direction shift: sh[kh, h, hp] = 1 iff hp == h + kh - P (zero pad in H)
    hh = jnp.arange(H)
    sh = (hh[None, :, None] + jnp.arange(K)[:, None, None] - P
          == hh[None, None, :]).astype(jnp.float32)               # (K, H, H)

    # M[c, hp*W + i, h*W + j] = sum_kh sh[kh, h, hp] * tw[c, kh, i, j]
    m = jnp.einsum("khg,ckij->cgihj", sh, tw)                     # (2, H, W, H, W)
    return m.reshape(2 * H * W, H * W)


def _vmem_limit_bytes():
    """~3/4 of per-core VMEM: <=48 MiB on v7x (64 MiB/TC), ~96 MiB on v5e/v6e."""
    cap = 64 * 1024 * 1024            # conservative fallback = v7x per-TC VMEM
    try:
        cap = int(pltpu.get_tpu_info().vmem_capacity_bytes)
    except Exception:
        pass
    return max(32 * 1024 * 1024, min(cap * 3 // 4, 100 * 1024 * 1024))


def _choose_tiling(N, C, HW, itemsize, slab_budget_bytes):
    """Pick (batch_tile, flat_layout).

    flat_layout=True presents x as (N, C*HW) with the batch tile on the sublane
    axis (must be a multiple of 8 -> perfect vreg packing even when C < 8).
    Otherwise x is (N, C, HW), whose second-minor block dim equals the full C
    and is therefore always a legal BlockSpec. Prefers >=2 grid steps so the
    "parallel" batch axis can shard across v7x's two TensorCores."""
    per_image = C * HW * itemsize
    cap = max(1, slab_budget_bytes // per_image)
    divisors = [d for d in range(1, N + 1) if N % d == 0 and d <= cap]
    flat_ok = (HW % 128 == 0)         # keep per-channel lane slices vreg-aligned
    flat = [d for d in divisors if d % 8 == 0] if flat_ok else []

    flat_multi = [d for d in flat if N // d >= 2]
    if flat_multi:
        return max(flat_multi), True
    any_multi = [d for d in divisors if N // d >= 2]
    if any_multi:
        return max(any_multi), False
    if flat:
        return max(flat), True
    return max(divisors), False


def spatial_gate(x, conv_weight):
    """x: (N, C, H, W); conv_weight: (1, 2, K, K) as in nn.Conv2d(2, 1, K, bias=False)."""
    N, C, H, W = x.shape
    HW = H * W
    itemsize = jnp.dtype(x.dtype).itemsize

    vmem_limit = _vmem_limit_bytes()
    m_bytes = (2 * HW) * HW * 2                       # bf16 fused conv operator
    if 2 * m_bytes > vmem_limit // 2:
        # TODO(synk): banded / H-tiled Toeplitz path for large spatial dims.
        raise NotImplementedError(
            f"dense conv-as-matmul operator ({2 * m_bytes} bytes double-buffered) "
            f"does not fit the VMEM budget ({vmem_limit} bytes); H*W too large "
            f"for the dense-operator path.")

    # Budget per grid step: 2x input + 2x output double buffers + operator + headroom.
    slab_budget = max(1 << 20, (vmem_limit - 2 * m_bytes) // 5)
    bt, flat = _choose_tiling(N, C, HW, itemsize, slab_budget)

    # Weight-only operator, stored in bf16 (single-pass MXU; halves its VMEM).
    m = _conv_as_matmul_operator(conv_weight, H, W).astype(jnp.bfloat16)

    kernel = functools.partial(_spatial_gate_kernel, C=C, HW=HW, flat=flat)
    if flat:
        x2 = x.reshape(N, C * HW)
        x_spec = pl.BlockSpec((bt, C * HW), lambda n: (n, 0))
        out_spec = pl.BlockSpec((bt, C * HW), lambda n: (n, 0))
        out_shape = jax.ShapeDtypeStruct((N, C * HW), x.dtype)
    else:
        x2 = x.reshape(N, C, HW)
        x_spec = pl.BlockSpec((bt, C, HW), lambda n: (n, 0, 0))
        out_spec = pl.BlockSpec((bt, C, HW), lambda n: (n, 0, 0))
        out_shape = jax.ShapeDtypeStruct((N, C, HW), x.dtype)

    out = pl.pallas_call(
        kernel,
        out_shape=out_shape,
        grid=(N // bt,),
        in_specs=[
            x_spec,
            # Conv operator: constant across the grid, a single full block.
            pl.BlockSpec((2 * HW, HW), lambda n: (0, 0)),
        ],
        out_specs=out_spec,
        compiler_params=pltpu.CompilerParams(
            dimension_semantics=("parallel",),        # batch steps are independent
            vmem_limit_bytes=vmem_limit),
    )(x2, m)
    return out.reshape(N, C, H, W)


def spatial_gate_ref(x, conv_weight):
    """Plain-JAX reference for correctness checking."""
    ch_max = jnp.max(x, axis=1, keepdims=True)
    ch_mean = jnp.mean(x, axis=1, keepdims=True)
    pooled = jnp.concatenate([ch_max, ch_mean], axis=1)           # (N, 2, H, W)
    conv = jax.lax.conv_general_dilated(
        pooled, conv_weight, window_strides=(1, 1), padding="SAME",
        dimension_numbers=("NCHW", "OIHW", "NCHW"),
        precision=jax.lax.Precision.HIGHEST)                      # (N, 1, H, W)
    return x * jax.nn.sigmoid(conv)


if __name__ == "__main__":
    key = jax.random.PRNGKey(0)
    kx, kw = jax.random.split(key)

    # Small shapes consistent with the module: batch=2, channels=4, spatial=16.
    x = jax.random.normal(kx, (2, 4, 16, 16), dtype=jnp.float32)
    # Deterministic synthetic Conv2d(2, 1, 5) weight (no bias in the module).
    conv_w = jax.random.normal(kw, (1, 2, 5, 5), dtype=jnp.float32) * 0.1

    out = spatial_gate(x, conv_w)
    jax.block_until_ready(out)

    ref = spatial_gate_ref(x, conv_w)
    max_err = float(jnp.max(jnp.abs(out - ref)))
    # bf16 MXU matmul feeding only a sigmoid gate -> looser tolerance than the
    # f32 HIGHEST reference.
    assert jnp.allclose(out, ref, atol=5e-2, rtol=5e-2), f"max_err={max_err}"

    print("KERNEL_OK")
</pallas_src>

<mosaic_0001>
module attributes {stable_mosaic.version = 11 : i64} {
  func.func @_spatial_gate_kernel(%arg0: i32, %arg1: memref<1x4x256xf32, #tpu.memory_space<vmem>>, %arg2: memref<512x256xbf16, #tpu.memory_space<vmem>>, %arg3: memref<1x4x256xf32, #tpu.memory_space<vmem>>) attributes {dimension_semantics = [#tpu.dimension_semantics<parallel>], iteration_bounds = array<i64: 2>, scalar_prefetch = 0 : i64, scratch_operands = 0 : i64, tpu.core_type = #tpu.core_type<tc>, window_params = [{transform_indices = @transform_0, window_bounds = array<i64: 1, 4, 256>}, {pipeline_mode = #tpu.pipeline_mode<synchronous>, transform_indices = @transform_1, window_bounds = array<i64: 512, 256>}, {transform_indices = @transform_2, window_bounds = array<i64: 1, 4, 256>}]} {
    %c0 = arith.constant 0 : index
    %c0_0 = arith.constant 0 : index
    %c0_1 = arith.constant 0 : index
    %0 = vector.load %arg1[%c0, %c0_0, %c0_1] : memref<1x4x256xf32, #tpu.memory_space<vmem>>, vector<1x4x256xf32>
    %cst = arith.constant dense<0xFF800000> : vector<1x256xf32>
    %1 = vector.multi_reduction <maximumf>, %0, %cst [1] : vector<1x4x256xf32> to vector<1x256xf32>
    %cst_2 = arith.constant dense<0.000000e+00> : vector<1x256xf32>
    %2 = vector.multi_reduction <add>, %0, %cst_2 [1] : vector<1x4x256xf32> to vector<1x256xf32>
    %cst_3 = arith.constant 2.500000e-01 : f32
    %3 = vector.broadcast %cst_3 : f32 to vector<1x256xf32>
    %4 = arith.mulf %2, %3 : vector<1x256xf32>
    %5 = tpu.concatenate %1, %4 in 1 : vector<1x256xf32>, vector<1x256xf32> -> vector<1x512xf32>
    %6 = arith.truncf %5 : vector<1x512xf32> to vector<1x512xbf16>
    %c0_4 = arith.constant 0 : index
    %c0_5 = arith.constant 0 : index
    %7 = vector.load %arg2[%c0_4, %c0_5] : memref<512x256xbf16, #tpu.memory_space<vmem>>, vector<512x256xbf16>
    %cst_6 = arith.constant dense<0.000000e+00> : vector<1x256xf32>
    %8 = tpu.matmul %6, %7, %cst_6 {dimension_numbers = #tpu.dot_dimension_numbers<[1], [0], [0], [1], [0, 0, 1, 1], [], []>} : vector<1x512xbf16>, vector<512x256xbf16>, vector<1x256xf32> -> vector<1x256xf32>
    %9 = arith.negf %8 : vector<1x256xf32>
    %10 = math.exp %9 : vector<1x256xf32>
    %cst_7 = arith.constant 1.000000e+00 : f32
    %11 = vector.broadcast %cst_7 : f32 to vector<1x256xf32>
    %12 = arith.addf %11, %10 : vector<1x256xf32>
    %13 = arith.divf %11, %12 : vector<1x256xf32>
    %14 = vector.shape_cast %13 : vector<1x256xf32> to vector<1x1x256xf32>
    %15 = vector.broadcast %14 : vector<1x1x256xf32> to vector<1x4x256xf32>
    %16 = arith.mulf %0, %15 : vector<1x4x256xf32>
    %c0_8 = arith.constant 0 : index
    %c0_9 = arith.constant 0 : index
    %c0_10 = arith.constant 0 : index
    %17 = vector.load %arg3[%c0_8, %c0_9, %c0_10] : memref<1x4x256xf32, #tpu.memory_space<vmem>>, vector<1x4x256xf32>
    tpu.vector_store %arg3[%c0_8, %c0_9, %c0_10], %16 {strides = array<i32>} : memref<1x4x256xf32, #tpu.memory_space<vmem>>, vector<1x4x256xf32>,
    return
  }
  func.func @transform_0(%arg0: i32) -> (i32, i32, i32) {
    %c0_i32 = arith.constant 0 : i32
    %c0_i32_0 = arith.constant 0 : i32
    %c0_i32_1 = arith.constant 0 : i32
    return %arg0, %c0_i32, %c0_i32_0 : i32, i32, i32
  }
  func.func @transform_1(%arg0: i32) -> (i32, i32) {
    %c0_i32 = arith.constant 0 : i32
    %c0_i32_0 = arith.constant 0 : i32
    %c0_i32_1 = arith.constant 0 : i32
    return %c0_i32, %c0_i32_0 : i32, i32
  }
  func.func @transform_2(%arg0: i32) -> (i32, i32, i32) {
    %c0_i32 = arith.constant 0 : i32
    %c0_i32_0 = arith.constant 0 : i32
    %c0_i32_1 = arith.constant 0 : i32
    return %arg0, %c0_i32, %c0_i32_0 : i32, i32, i32
  }
}

</mosaic_0001>

<bundles_post_ra>
// kernel: tpu_custom_call.1
= control target key start
LH: loop header
LB: loop body
LE: loop exit
PB: predicated region body
PF: predicated region fallthrough
CT: control target
= control target key end

     0   :  { %7 = vsyncpa [#allocation3], 0  ;;  %s1415_s0 = inlined_call_operand.hbm [shape: f32[2,4,256], index: 0, kind: input, shape index: {}]   ;;  %s1416_s1 = inlined_call_operand.hbm [shape: bf16[512,256], index: 1, kind: input, shape index: {}]   ;;  %s1417_s2 = inlined_call_operand.hbm [shape: f32[2,4,256], index: 2, kind: output, shape index: {}]  }
   0x1   :  { %9 = vsyncpa [#allocation3 + $0x1], 0 }
   0x2   :  { %10 = vsyncpa [#allocation6], 0 }
   0x3   :  { %11 = vsyncpa [#allocation4], 0 }
   0x4   :  { %13 = vsyncpa [#allocation4 + $0x1], 0  ;;  %s1201_s9 = smov 0   ;;  %s1203_s10 = smov 0  }
   0x5   :  { %s1205_s11 = smov 0   ;;  %s1207_s12 = smov 0  }
   0x6 LB: > { %s1222_s13 = sadd.s32 4294967295, %s1179_s12   ;;  %s801_s14 = sadd.s32 4294967294, %s1179_s12   ;;  %s1179_s12 = sphi %s1207_s12, %s1437_s12   ;;  %s1175_s11 = sphi %s1205_s11, %s1436_s11   ;;  %s1171_s10 = sphi %s1203_s10, %s1435_s10   ;;  %s1167_s9 = sphi %s1201_s9, %s1434_s9  }
   0x7   : > { %p39_p0 = scmp.ne.s32.totalorder %s1171_s10, %s1167_s9  ;;  %p1418_p1 = scmp.eq.s32.totalorder %s1222_s13, 0 }
   0x8   : > { %p90_p3 = scmp.eq.s32.totalorder %s801_s14, 1  ;;  %p802_p5 = scmp.ge.s32.totalorder %s1179_s12, 1 }
   0x9   : > { %p1231_p4 = por %p1418_p1, %p39_p0  ;;  %p97_p7 = scmp.lt.s32.totalorder %s1179_s12, 3 }
   0xa   : > { %p1236_p6 = por %p90_p3, %p39_p0  ;;  %s1181_s18 = smov [#allocation5]  }
   0xb   : > { %s1421_s15 = scalar_select %p1231_p4, 1, 0 }
   0xc   : > { %s1422_s16 = scalar_select %p1236_p6, 1, 0 }
   0xd   : > { %p1241_p8 = pnand %p802_p5, %p97_p7  ;;  %s109_s19 = sshll.u32 %s1181_s18, 4  ;;  %s1245_s19 = int_to_ptr.vmem [resolvable:$true] %s109_s19 }
   0xe   : > { %s1257_s21 = sadd.s32 1, %s1179_s12   ;;  %s26_s22 = sadd.s32 1, %s1175_s11 }
   0xf   : > { %s1423_s17 = scalar_select %p1241_p8, 1, 0 }
  0x10   : > { %p895_p9 = pneg %p1241_p8  ;;  %s23_s23 = ssub.s32 %s1179_s12, %s1257_s21 }
  0x11   : > { %s1051_s26 = scalar_lea.hbm %s1416_s1, 8192 }
  0x12   : > { %p1252_p11 = pnand %p895_p9, %p1418_p1  ;;  %p1052_p12 = scmp.ne.s32.totalorder %s1416_s1, %s1051_s26 }
  0x13   : > { %p1058_p5 = scmp.lt.u32.totalorder %s1051_s26, %s1416_s1 }
  0x14   : > { %p1053_p13 = pneg %p1252_p11 }
  0x16   : > { %p1054_p0 = pnand %p1053_p13, %p1052_p12 }
  0x18   : > { %p1055_p3 = pneg %p1054_p0 }
  0x1a   : > { %p1060_p7 = pnand %p1058_p5, %p1055_p3 }
  0x1c   : > { %1063 = shalt.err (!%p1060_p7)
}
  0x1d   : > { %s1064_s3 = scalar_lea.vmem %s1245_s19, 8192  ;;  %p1072_p2 = scmp.lt.s32.totalorder %s1245_s19, %s1245_s19 }
  0x1e   : > { %p1065_p9 = scmp.ne.s32.totalorder %s1245_s19, %s1064_s3  ;;  %p1073_p6 = scmp.lt.s32.totalorder %s1064_s3, %s1064_s3 }
  0x20   : > { %p1067_p10 = pnand %p1065_p9, %p1053_p13  ;;  %p1074_p4 = por %p1073_p6, %p1072_p2 }
  0x22   : > { %p1068_p1 = pneg %p1067_p10 }
  0x24   : > { %p1075_p8 = pnand %p1074_p4, %p1068_p1 }
  0x26   : > { %1078 = shalt.err (!%p1075_p8)
}
  0x27   : > { %s1182_s4 = smov 128   ;;  %s1183_s5 = smov 8  }
  0x28   : > { %898 = dma.hbm_to_vmem [thread:$0]  (!%p1252_p11), %s1416_s1, 8192, %s1245_s19, [#allocation6], %s1182_s4, %s1182_s4, %s1183_s5  }
  0x29   : > { %p24_p2 = scmp.eq.s32.totalorder %s23_s23, 0  ;;  %p33_p1 = scmp.ne.s32.totalorder %s1175_s11, %s1171_s10 }
  0x2a   : > { %p34_p4 = scmp.eq.s32.totalorder %s1179_s12, 0  ;;  %p908_p6 = scmp.lt.s32.totalorder %s1179_s12, 2 }
  0x2b   : > { %s1288_s8 = scalar_select %p24_p2, %s1175_s11, %s26_s22  }
  0x2c   : > { %p35_p8 = por %p34_p4, %p33_p1  ;;  %p1425_p10 = scmp.eq.s32.totalorder %s1222_s13, 1 }
  0x2d   : > { %s123_s18 = sand.u32 1, %s1175_s11   ;;  %s883_s24 = sshll.u32 %s1179_s12, 7 }
  0x2e   : > { %p1292_p12 = por %p1425_p10, %p33_p1  ;;  %s805_s25 = sshll.u32 %s123_s18, 3 }
  0x2f   : > { %s1301_s27 = scalar_lea.hbm %s1415_s0, %s883_s24  ;;  %s127_s19 = scalar_lea.vmem [#allocation2], %s805_s25 }
  0x30   : > { %s135_s22 = sshll.u32 %s127_s19, 4  ;;  %p1303_p11 = pnand %p908_p6, %p35_p8  ;;  %s1307_s22 = int_to_ptr.vmem [resolvable:$true] %s135_s22 }
  0x31   : > { %s124_s28 = scalar_lea.sflag [#allocation3], %s123_s18  ;;  %s1079_s29 = scalar_lea.hbm %s1301_s27, 128 }
  0x32   : > { %p1080_p13 = scmp.ne.s32.totalorder %s1301_s27, %s1079_s29  ;;  %p1081_p0 = pneg %p1303_p11 }
  0x33   : > { %s1084_s4 = scalar_lea.hbm %s1415_s0, 256  ;;  %p1085_p7 = scmp.lt.u32.totalorder %s1301_s27, %s1415_s0 }
  0x34   : > { %p1082_p3 = pnand %p1081_p0, %p1080_p13  ;;  %p1086_p9 = scmp.lt.u32.totalorder %s1084_s4, %s1079_s29 }
  0x35   : > { %p1088_p1 = scmp.lt.u32.totalorder %s1079_s29, %s1301_s27 }
  0x36   : > { %p1083_p5 = pneg %p1082_p3  ;;  %p1087_p2 = por %p1086_p9, %p1085_p7 }
  0x38   : > { %p1089_p4 = por %p1088_p1, %p1087_p2 }
  0x3a   : > { %p1090_p6 = pnand %p1089_p4, %p1083_p5 }
  0x3c   : > { %1093 = shalt.err (!%p1090_p6)
}
  0x3d   : > { %s1094_s7 = scalar_lea.vmem %s1307_s22, 128  ;;  %s1184_s18 = smov [#allocation2]  }
  0x3e   : > { %p1095_p8 = scmp.ne.s32.totalorder %s1307_s22, %s1094_s7  ;;  %s1099_s24 = sshll.u32 %s1184_s18, 4  ;;  %s1100_s24 = int_to_ptr.vmem [resolvable:$false] %s1099_s24 }
  0x3f   : > { %s1101_s25 = scalar_lea.vmem %s1100_s24, 256  ;;  %p1102_p3 = scmp.lt.s32.totalorder %s1307_s22, %s1100_s24 }
  0x40   : > { %p1097_p10 = pnand %p1095_p8, %p1081_p0  ;;  %p1103_p7 = scmp.lt.s32.totalorder %s1101_s25, %s1094_s7 }
  0x42   : > { %p1098_p13 = pneg %p1097_p10  ;;  %p1104_p9 = por %p1103_p7, %p1102_p3 }
  0x44   : > { %p1105_p2 = pnand %p1104_p9, %p1098_p13 }
  0x46   : > { %1108 = shalt.err (!%p1105_p2)
}
  0x47   : > { %902 = dma.hbm_to_vmem [thread:$0]  (!%p1303_p11), %s1301_s27, 128, %s1307_s22, %s124_s28  }
  0x48   : > { %p1428_p5 = scmp.ne.s32.totalorder %s1423_s17, 0 }
  0x49   : > { %s1337_s20 = sand.u32 (!%p1428_p5), 1, %s1171_s10   ;;  %p1429_p0 = scmp.ne.s32.totalorder (!%p1428_p5), %s1421_s15, 0 }
  0x4a   : > { %144 = sbr.rel (%p1428_p5) target bundleno = 412 (0x19c), region = 28  ;;  %s809_s26 = sshll.u32 (!%p1428_p5), %s1337_s20, 3 }
  0x4b   : > { %s147_s19 = scalar_lea.sflag (!%p1428_p5), [#allocation3], %s1337_s20  ;;  %s1343_s29 = scalar_lea.vmem (!%p1428_p5), [#allocation2], %s809_s26 }
  0x51   : > { %1154 = dma.done.wait (%p1429_p0), %s147_s19, 128  }
  0x52   : > { %1156 = vsyncadd (%p1429_p0), %s147_s19, 4294967168  ;;  %p1430_p11 = scmp.eq.s32.totalorder %s1222_s13, 0 }
  0x54   : > { %1158 = dma.done.wait (%p1430_p11), [#allocation6], 8192   ;;  %p1431_p1 = pmov %p1430_p11 }
  0x55   : > { %v946_v0 = vld [vmem:[#allocation5 + $0x4] ss:$8 sps:$4 sm:$0xff]   ;;  %v950_v2 = vld [vmem:[#allocation5] ss:$8 sps:$4 sm:$0xff]   ;;  %v952_v4 = vld [vmem:[#allocation5 + $0x14] ss:$8 sps:$4 sm:$0xff]  }
  0x56   : > { %1160 = vsyncadd (%p1431_p1), [#allocation6], 4294959104  ;;  %v948_v1 = vld [vmem:[#allocation5 + $0x104] ss:$8 sps:$4 sm:$0xff]   ;;  %598 = vmatprep.subr.bf16.mxu1 %v946_v0  ;;  %v951_v3 = vld [vmem:[#allocation5 + $0x100] ss:$8 sps:$4 sm:$0xff]  }
  0x57   : > { %639 = vmatprep.subr.bf16.mxu0 %v948_v1  ;;  %599 = vmatpush1.bf16.msra.mxu1 %v950_v2  ;;  %v954_v5 = vld [vmem:[#allocation5 + $0x114] ss:$8 sps:$4 sm:$0xff]   ;;  %v956_v6 = vld [vmem:[#allocation5 + $0x10] ss:$8 sps:$4 sm:$0xff]   ;;  %v958_v8 = vld [vmem:[#allocation5 + $0x24] ss:$8 sps:$4 sm:$0xff]  }
  0x58   : > { %640 = vmatpush1.bf16.msra.mxu0 %v951_v3  ;;  %600 = vmatprep.subr.bf16.mxu1 %v952_v4  ;;  %v957_v7 = vld [vmem:[#allocation5 + $0x110] ss:$8 sps:$4 sm:$0xff]   ;;  %v960_v9 = vld [vmem:[#allocation5 + $0x124] ss:$8 sps:$4 sm:$0xff]   ;;  %v962_v10 = vld [vmem:[#allocation5 + $0x20] ss:$8 sps:$4 sm:$0xff]  }
  0x59   : > { %641 = vmatprep.subr.bf16.mxu0 %v954_v5  ;;  %v963_v11 = vld [vmem:[#allocation5 + $0x120] ss:$8 sps:$4 sm:$0xff]   ;;  %v964_v12 = vld [vmem:[#allocation5 + $0x34] ss:$8 sps:$4 sm:$0xff]   ;;  %v968_v14 = vld [vmem:[#allocation5 + $0x30] ss:$8 sps:$4 sm:$0xff]  }
  0x5a   : > { %v966_v13 = vld [vmem:[#allocation5 + $0x134] ss:$8 sps:$4 sm:$0xff]   ;;  %v969_v15 = vld [vmem:[#allocation5 + $0x130] ss:$8 sps:$4 sm:$0xff]   ;;  %v970_v16 = vld [vmem:[#allocation5 + $0x44] ss:$8 sps:$4 sm:$0xff]  }
  0x5b   : > { %601 = vmatpush1.bf16.msra.mxu1 %v956_v6  ;;  %v972_v17 = vld [vmem:[#allocation5 + $0x144] ss:$8 sps:$4 sm:$0xff]   ;;  %v974_v18 = vld [vmem:[#allocation5 + $0x40] ss:$8 sps:$4 sm:$0xff]   ;;  %v976_v20 = vld [vmem:[#allocation5 + $0x54] ss:$8 sps:$4 sm:$0xff]  }
  0x5c   : > { %642 = vmatpush1.bf16.msra.mxu0 %v957_v7  ;;  %602 = vmatprep.subr.bf16.mxu1 %v958_v8  ;;  %v975_v19 = vld [vmem:[#allocation5 + $0x140] ss:$8 sps:$4 sm:$0xff]   ;;  %v978_v21 = vld [vmem:[#allocation5 + $0x154] ss:$8 sps:$4 sm:$0xff]   ;;  %v980_v22 = vld [vmem:[#allocation5 + $0x50] ss:$8 sps:$4 sm:$0xff]  }
  0x5d   : > { %643 = vmatprep.subr.bf16.mxu0 %v960_v9  ;;  %v981_v23 = vld [vmem:[#allocation5 + $0x150] ss:$8 sps:$4 sm:$0xff]   ;;  %v982_v24 = vld [vmem:[#allocation5 + $0x64] ss:$8 sps:$4 sm:$0xff]   ;;  %v986_v26 = vld [vmem:[#allocation5 + $0x60] ss:$8 sps:$4 sm:$0xff]  }
  0x5e   : > { %v984_v25 = vld [vmem:[#allocation5 + $0x164] ss:$8 sps:$4 sm:$0xff]   ;;  %v987_v27 = vld [vmem:[#allocation5 + $0x160] ss:$8 sps:$4 sm:$0xff]   ;;  %v988_v28 = vld [vmem:[#allocation5 + $0x74] ss:$8 sps:$4 sm:$0xff]  }
  0x5f   : > { %603 = vmatpush1.bf16.msra.mxu1 %v962_v10  ;;  %v990_v29 = vld [vmem:[#allocation5 + $0x174] ss:$8 sps:$4 sm:$0xff]   ;;  %v992_v30 = vld [vmem:[#allocation5 + $0x70] ss:$8 sps:$4 sm:$0xff]   ;;  %v994_v32 = vld [vmem:[#allocation5 + $0x84] ss:$8 sps:$4 sm:$0xff]  }
  0x60   : > { %644 = vmatpush1.bf16.msra.mxu0 %v963_v11  ;;  %604 = vmatprep.subr.bf16.mxu1 %v964_v12  ;;  %v993_v31 = vld [vmem:[#allocation5 + $0x170] ss:$8 sps:$4 sm:$0xff]   ;;  %v996_v33 = vld [vmem:[#allocation5 + $0x184] ss:$8 sps:$4 sm:$0xff]   ;;  %v998_v34 = vld [vmem:[#allocation5 + $0x80] ss:$8 sps:$4 sm:$0xff]  }
  0x61   : > { %645 = vmatprep.subr.bf16.mxu0 %v966_v13  ;;  %v999_v35 = vld [vmem:[#allocation5 + $0x180] ss:$8 sps:$4 sm:$0xff]   ;;  %v1000_v36 = vld [vmem:[#allocation5 + $0x94] ss:$8 sps:$4 sm:$0xff]   ;;  %v1004_v38 = vld [vmem:[#allocation5 + $0x90] ss:$8 sps:$4 sm:$0xff]  }
  0x62   : > { %v1002_v37 = vld [vmem:[#allocation5 + $0x194] ss:$8 sps:$4 sm:$0xff]   ;;  %v1005_v39 = vld [vmem:[#allocation5 + $0x190] ss:$8 sps:$4 sm:$0xff]   ;;  %v1006_v40 = vld [vmem:[#allocation5 + $0xa4] ss:$8 sps:$4 sm:$0xff]  }
  0x63   : > { %605 = vmatpush1.bf16.msra.mxu1 %v968_v14  ;;  %v1008_v41 = vld [vmem:[#allocation5 + $0x1a4] ss:$8 sps:$4 sm:$0xff]   ;;  %v1010_v42 = vld [vmem:[#allocation5 + $0xa0] ss:$8 sps:$4 sm:$0xff]   ;;  %v1012_v44 = vld [vmem:[#allocation5 + $0xb4] ss:$8 sps:$4 sm:$0xff]  }
  0x64   : > { %646 = vmatpush1.bf16.msra.mxu0 %v969_v15  ;;  %606 = vmatprep.subr.bf16.mxu1 %v970_v16  ;;  %v1011_v43 = vld [vmem:[#allocation5 + $0x1a0] ss:$8 sps:$4 sm:$0xff]   ;;  %vm179_vm0 = vcmask 1043456   ;;  %v1014_v45 = vld [vmem:[#allocation5 + $0x1b4] ss:$8 sps:$4 sm:$0xff]   ;;  %s884_s15 = sshll.u32 %s1222_s13, 7 }
  0x65   : > { %647 = vmatprep.subr.bf16.mxu0 %v972_v17  ;;  %v1354_v46 = vld [vmem:[%s1343_s29] sm:$0xff]  ;;  %v1018_v54 = vld [vmem:[#allocation5 + $0xc4] ss:$8 sps:$4 sm:$0xff]   ;;  %v1022_v62 = vld [vmem:[#allocation5 + $0xc0] ss:$8 sps:$4 sm:$0xff]   ;;  %s174_s17 = scalar_lea.vmem [#allocation7], %s809_s26  ;;  %s1371_s28 = scalar_lea.hbm %s1417_s2, %s884_s15 }
  0x66   : > { %v177_v47 = vcombine.high %v1354_v46, %v1354_v46  ;;  %v180_v48 = vsel %vm179_vm0, %v1354_v46, -inf  ;;  %v194_v49 = vsel %vm179_vm0, %v1354_v46, 0.0  ;;  %v1016_v50 = vld [vmem:[#allocation5 + $0xb0] ss:$8 sps:$4 sm:$0xff]   ;;  %v1020_v55 = vld [vmem:[#allocation5 + $0x1c4] ss:$8 sps:$4 sm:$0xff]  }
  0x67   : > { %607 = vmatpush1.bf16.msra.mxu1 %v974_v18  ;;  %v1017_v51 = vld [vmem:[#allocation5 + $0x1b0] ss:$8 sps:$4 sm:$0xff]   ;;  %v181_v52 = vrot.slane %v180_v48, 4  ;;  %v195_v53 = vrot.slane %v194_v49, 4  ;;  %v1023_v63 = vld [vmem:[#allocation5 + $0x1c0] ss:$8 sps:$4 sm:$0xff]  }
  0x68   : > { %648 = vmatpush1.bf16.msra.mxu0 %v975_v19  ;;  %608 = vmatprep.subr.bf16.mxu1 %v976_v20  ;;  %v187_v56 = vsel %vm179_vm0, %v177_v47, -inf  ;;  %v201_v57 = vsel %vm179_vm0, %v177_v47, 0.0  ;;  %v1024_v4 = vld [vmem:[#allocation5 + $0xd4] ss:$8 sps:$4 sm:$0xff]   ;;  %v1028_v10 = vld [vmem:[#allocation5 + $0xd0] ss:$8 sps:$4 sm:$0xff]  }
  0x69   : > { %649 = vmatprep.subr.bf16.mxu0 %v978_v21  ;;  %v188_v58 = vrot.slane %v187_v56, 4  ;;  %v202_v59 = vrot.slane %v201_v57, 4  ;;  %v182_v60 = vmax.f32 %v180_v48, %v181_v52  ;;  %v196_v61 = vadd.f32 %v195_v53, %v194_v49  ;;  %v1026_v5 = vld [vmem:[#allocation5 + $0x1d4] ss:$8 sps:$4 sm:$0xff]   ;;  %v1029_v11 = vld [vmem:[#allocation5 + $0x1d0] ss:$8 sps:$4 sm:$0xff]  }
  0x6a   : > { %v1030_v15 = vld [vmem:[#allocation5 + $0xe4] ss:$8 sps:$4 sm:$0xff]   ;;  %v1034_v21 = vld [vmem:[#allocation5 + $0xe0] ss:$8 sps:$4 sm:$0xff]   ;;  %v692_v53 = vlaneseq  ;;  %s721_s27 = sshll.u32 %s174_s17, 4  ;;  %s707_s30 = scalar_lea.sflag [#allocation4], %s1337_s20  ;;  %s1373_s27 = int_to_ptr.vmem [resolvable:$true] %s721_s27 }
  0x6b   : > { %609 = vmatpush1.bf16.msra.mxu1 %v980_v22  ;;  %v189_v0 = vmax.f32 %v187_v56, %v188_v58  ;;  %v203_v1 = vadd.f32 %v202_v59, %v201_v57  ;;  %v183_v2 = vrot.slane %v182_v60, 2  ;;  %v197_v3 = vrot.slane %v196_v61, 2  ;;  %v1032_v16 = vld [vmem:[#allocation5 + $0x1e4] ss:$8 sps:$4 sm:$0xff]   ;;  %v1035_v22 = vld [vmem:[#allocation5 + $0x1e0] ss:$8 sps:$4 sm:$0xff]  }
  0x6c   : > { %650 = vmatpush1.bf16.msra.mxu0 %v981_v23  ;;  %610 = vmatprep.subr.bf16.mxu1 %v982_v24  ;;  %s1109_s3 = scalar_lea.vmem %s1373_s27, 128  ;;  %s1185_s13 = smov [#allocation7]  }
  0x6d   : > { %651 = vmatprep.subr.bf16.mxu0 %v984_v25  ;;  %v190_v6 = vrot.slane %v189_v0, 2  ;;  %v204_v7 = vrot.slane %v203_v1, 2  ;;  %v198_v8 = vadd.f32 %v197_v3, %v196_v61  ;;  %v184_v9 = vmax.f32 %v182_v60, %v183_v2  ;;  %v1036_v25 = vld [vmem:[#allocation5 + $0xf4] ss:$8 sps:$4 sm:$0xff]   ;;  %p1110_p4 = scmp.ne.s32.totalorder %s1373_s27, %s1109_s3  ;;  %s1113_s4 = sshll.u32 %s1185_s13, 4  ;;  %s1114_s4 = int_to_ptr.vmem [resolvable:$false] %s1113_s4 }
  0x6e   : > { %s1115_s5 = scalar_lea.vmem %s1114_s4, 256  ;;  %p1116_p10 = scmp.lt.s32.totalorder %s1373_s27, %s1114_s4 }
  0x6f   : > { %611 = vmatpush1.bf16.msra.mxu1 %v986_v26  ;;  %v191_v12 = vmax.f32 %v189_v0, %v190_v6  ;;  %v205_v13 = vadd.f32 %v204_v7, %v203_v1  ;;  %v199_v14 = vrot.slane %v198_v8, 1  ;;  %v185_v19 = vrot.slane %v184_v9, 1  ;;  %v1038_v26 = vld [vmem:[#allocation5 + $0x1f4] ss:$8 sps:$4 sm:$0xff]   ;;  %p1111_p6 = pnand %p1110_p4, %p1292_p12  ;;  %p1117_p13 = scmp.lt.s32.totalorder %s1115_s5, %s1109_s3 }
  0x70   : > { %652 = vmatpush1.bf16.msra.mxu0 %v987_v27  ;;  %612 = vmatprep.subr.bf16.mxu1 %v988_v28 }
  0x71   : > { %653 = vmatprep.subr.bf16.mxu0 %v990_v29  ;;  %v192_v17 = vrot.slane %v191_v12, 1  ;;  %v206_v18 = vrot.slane %v205_v13, 1  ;;  %v200_v20 = vadd.f32 %v199_v14, %v198_v8  ;;  %v186_v29 = vmax.f32 %v184_v9, %v185_v19  ;;  %p1112_p8 = pneg %p1111_p6  ;;  %p1118_p3 = por %p1117_p13, %p1116_p10 }
  0x73   : > { %613 = vmatpush1.bf16.msra.mxu1 %v992_v30  ;;  %v193_v23 = vmax.f32 %v191_v12, %v192_v17  ;;  %v207_v24 = vadd.f32 %v206_v18, %v205_v13  ;;  %v208_v30 = vmul.f32 0.25, %v200_v20  ;;  %p1119_p7 = pnand %p1118_p3, %p1112_p8 }
  0x74   : > { %654 = vmatpush1.bf16.msra.mxu0 %v993_v31  ;;  %614 = vmatprep.subr.bf16.mxu1 %v994_v32  ;;  %v1040_v31 = vld [vmem:[#allocation5 + $0xf0] ss:$8 sps:$4 sm:$0xff]  }
  0x75   : > { %655 = vmatprep.subr.bf16.mxu0 %v996_v33  ;;  %v211_v27 = vpack.c.bf16 %v193_v23, %v193_v23  ;;  %v209_v28 = vmul.f32 0.25, %v207_v24  ;;  %v1041_v32 = vld [vmem:[#allocation5 + $0x1f0] ss:$8 sps:$4 sm:$0xff]  }
  0x77   : > { %615 = vmatpush1.bf16.msra.mxu1 %v998_v34  ;;  %v213_v33 = vpack.c.bf16 %v209_v28, %v209_v28  ;;  %630 = vmatprep.mubr.bf16.mxu1 %v211_v27  ;;  %v210_v34 = vpack.c.bf16 %v186_v29, %v186_v29 }
  0x78   : > { %656 = vmatpush1.bf16.msra.mxu0 %v999_v35  ;;  %616 = vmatprep.subr.bf16.mxu1 %v1000_v36  ;;  %v212_v35 = vpack.c.bf16 %v208_v30, %v208_v30 }
  0x79   : > { %657 = vmatprep.subr.bf16.mxu0 %v1002_v37  ;;  %671 = vmatprep.mubr.bf16.mxu0 %v213_v33 }
  0x7b   : > { %617 = vmatpush1.bf16.msra.mxu1 %v1004_v38 }
  0x7c   : > { %658 = vmatpush1.bf16.msra.mxu0 %v1005_v39  ;;  %618 = vmatprep.subr.bf16.mxu1 %v1006_v40 }
  0x7d   : > { %659 = vmatprep.subr.bf16.mxu0 %v1008_v41 }
  0x7f   : > { %619 = vmatpush1.bf16.msra.mxu1 %v1010_v42 }
  0x80   : > { %660 = vmatpush1.bf16.msra.mxu0 %v1011_v43  ;;  %620 = vmatprep.subr.bf16.mxu1 %v1012_v44 }
  0x81   : > { %661 = vmatprep.subr.bf16.mxu0 %v1014_v45 }
  0x83   : > { %621 = vmatpush1.bf16.msra.mxu1 %v1016_v50 }
  0x84   : > { %662 = vmatpush1.bf16.msra.mxu0 %v1017_v51  ;;  %622 = vmatprep.subr.bf16.mxu1 %v1018_v54  ;;  %v693_v54 = vshrl.u32 %v692_v53, 7 }
  0x85   : > { %663 = vmatprep.subr.bf16.mxu0 %v1020_v55 }
  0x86   : > { %v694_v55 = vsub.s32 0, %v693_v54 }
  0x87   : > { %623 = vmatpush1.bf16.msra.mxu1 %v1022_v62 }
  0x88   : > { %664 = vmatpush1.bf16.msra.mxu0 %v1023_v63  ;;  %624 = vmatprep.subr.bf16.mxu1 %v1024_v4 }
  0x89   : > { %665 = vmatprep.subr.bf16.mxu0 %v1026_v5 }
  0x8b   : > { %625 = vmatpush1.bf16.msra.mxu1 %v1028_v10 }
  0x8c   : > { %666 = vmatpush1.bf16.msra.mxu0 %v1029_v11  ;;  %626 = vmatprep.subr.bf16.mxu1 %v1030_v15 }
  0x8d   : > { %667 = vmatprep.subr.bf16.mxu0 %v1032_v16 }
  0x8f   : > { %627 = vmatpush1.bf16.msra.mxu1 %v1034_v21 }
  0x90   : > { %668 = vmatpush1.bf16.msra.mxu0 %v1035_v22  ;;  %628 = vmatprep.subr.bf16.mxu1 %v1036_v25 }
  0x91   : > { %669 = vmatprep.subr.bf16.mxu0 %v1038_v26 }
  0x93   : > { %629 = vmatpush1.bf16.msra.mxu1 %v1040_v31 }
  0x94   : > { %670 = vmatpush1.bf16.msra.mxu0 %v1041_v32 }
  0x96   : > { %631 = vmatmul.mubr.bf16.vlgmr.msra.gmra.mrb[0].mxu1 %v210_v34 }
  0x97   : > { %672 = vmatmul.mubr.bf16.vlgmr.msra.gmra.mrb[0].mxu0 %v212_v35 }
 0x169   : > { %v632_v36 = vpop.f32.mrb[0].mxu1 }
 0x16a   : > { %v673_v37 = vpop.f32.mrb[0].mxu0  ;;  %v634_v39 = vpop.f32.mrb[1].mxu1 }
 0x16b   : > { %v674_v38 = vadd.f32 %v673_v37, %v632_v36  ;;  %v675_v40 = vpop.f32.mrb[1].mxu0  ;;  %v636_v42 = vpop.f32.mrb[2].mxu1 }
 0x16c   : > { %v676_v41 = vadd.f32 %v675_v40, %v634_v39  ;;  %v677_v43 = vpop.f32.mrb[2].mxu0  ;;  %v637_v45 = vpop.f32.mrb[3].mxu1 }
 0x16d   : > { %v876_v44 = vmul.f32 -1.442695, %v674_v38  ;;  %v678_v47 = vpop.f32.mrb[3].mxu0 }
 0x16e   : > { %v877_v48 = vmul.f32 -1.442695, %v676_v41 }
 0x16f   : > { %1043 = vpow2.f32 %v876_v44 }
 0x170   : > { %1045 = vpow2.f32 %v877_v48 }
 0x179   : > { %v1044_v49 = vpop.eup %1043 }
 0x17a   : > { %v1046_v50 = vpop.eup %1045  ;;  %v686_v51 = vadd.f32 1.0, %v1044_v49 }
 0x17b   : > { %v687_v52 = vadd.f32 1.0, %v1046_v50 }
 0x17c   : > { %1047 = vrcp.f32 %v686_v51 }
 0x17d   : > { %1049 = vrcp.f32 %v687_v52 }
 0x186   : > { %v1048_v56 = vpop.eup %1047 }
 0x187   : > { %v1050_v57 = vpop.eup %1049  ;;  %v695_v58 = vrot.slane %v1048_v56, %v694_v55 }
 0x188   : > { %v699_v59 = vrot.slane %v1050_v57, %v694_v55 }
 0x18a   : > { %v702_v60 = vcombine.low %v695_v58, %v699_v59 }
 0x18c   : > { %v704_v61 = vmul.f32 %v702_v60, %v1354_v46 }
 0x18e   : > { %705 = vst [vmem:[%s174_s17] sm:$0xff] %v704_v61 }
 0x18f   : > { %1122 = shalt.err (!%p1119_p7)
}
 0x190   : > { %s1123_s6 = scalar_lea.hbm %s1371_s28, 128  ;;  %s1127_s24 = scalar_lea.hbm %s1417_s2, 256 }
 0x191   : > { %p1124_p9 = scmp.ne.s32.totalorder %s1371_s28, %s1123_s6  ;;  %p1128_p0 = scmp.lt.u32.totalorder %s1371_s28, %s1417_s2 }
 0x192   : > { %p1129_p11 = scmp.lt.u32.totalorder %s1127_s24, %s1123_s6  ;;  %p1131_p4 = scmp.lt.u32.totalorder %s1123_s6, %s1371_s28 }
 0x193   : > { %p1125_p2 = pnand %p1124_p9, %p1292_p12 }
 0x194   : > { %p1130_p1 = por %p1129_p11, %p1128_p0 }
 0x195   : > { %p1126_p5 = pneg %p1125_p2 }
 0x196   : > { %p1132_p6 = por %p1131_p4, %p1130_p1 }
 0x198   : > { %p1133_p8 = pnand %p1132_p6, %p1126_p5 }
 0x19a   : > { %1136 = shalt.err (!%p1133_p8)
}
 0x19b   : > { %893 = dma.vmem_to_hbm [thread:$0]  (%p1292_p12), %s1373_s27, 128, %s1371_s28, %s707_s30  }
 0x19c PF: > { %s733_s26 = sand.u32 1, %s1167_s9   ;;  %p1432_p10 = scmp.ne.s32.totalorder %s1422_s16, 0 }
 0x19d   : > { %p1433_p13 = scmp.ge.s32.totalorder %s1179_s12, 2  ;;  %s734_s19 = scalar_lea.sflag [#allocation4], %s733_s26 }
 0x19f   : > { %p904_p3 = pnand %p1433_p13, %p1432_p10 }
 0x1a1   : > { %1162 = dma.done.wait (!%p904_p3), %s734_s19, 128  }
 0x1a2   : > { %1164 = vsyncadd (!%p904_p3), %s734_s19, 4294967168  ;;  %p16_p7 = scmp.ge.s32.totalorder %s1257_s21, 4   ;;  %s1434_s9 = smov %s1171_s10 }
 0x1a3   : > { %s1435_s10 = smov %s1175_s11  ;;  %s1436_s11 = smov %s1288_s8 }
 0x1a4   : > { %s1437_s12 = smov %s1257_s21  ;;  %18 = sbr.rel (!%p16_p7) target bundleno = 6 (0x6), region = 77 }
 0x1ab   :  { %739 = vsyncpa [#allocation3], 1 }
 0x1ac   :  { %741 = vsyncpa [#allocation3 + $0x1], 1 }
 0x1ad   :  { %742 = vsyncpa [#allocation6], 1 }
 0x1ae   :  { %743 = vsyncpa [#allocation4], 1 }
 0x1af   :  { %745 = vsyncpa [#allocation4 + $0x1], 1 }

</bundles_post_ra>
